<compile_context>
chip_gen: v5e
topology: v5e:2x2
jax: 0.10.0
libtpu: 0.0.40
codegen_flags: <defaults>
</compile_context>

<pallas_src>
import math

import jax
import jax.numpy as jnp
from jax.experimental import pallas as pl
from jax.experimental.pallas import tpu as pltpu


# ---------------------------------------------------------------------------
# Kernel
# ---------------------------------------------------------------------------
def bound_leaky_relu_step_kernel(x_ref, p_ref, o_ref):
    x = x_ref[...]               # (tile_n, tile_f)
    right = p_ref[0:1, :]        # (1, tile_f) -> broadcasts over batch rows
    ls = p_ref[1:2, :]           # left_slope
    rs = p_ref[2:3, :]           # right_slope

    # Right branch: rs*x + (1-rs)*right  ==  rs*(x - right) + right  (one FMA).
    right_val = rs * (x - right) + right
    # Nested selects (no bool->f32 mask multiplies, no 0*inf hazard).
    o_ref[...] = jnp.where(x < 0.0, ls * x, jnp.where(x > right, right_val, x))


# ---------------------------------------------------------------------------
# Tiling / budgeting helpers
# ---------------------------------------------------------------------------
def _vmem_capacity_bytes():
    """Per-TensorCore VMEM capacity; conservative fallback if query fails."""
    try:
        cap = getattr(pltpu.get_tpu_info(), "vmem_capacity_bytes", None)
        if cap:
            return int(cap)
    except Exception:
        pass
    return 64 * 1024 * 1024      # v7x per-TC size: safe lower bound everywhere


def _select_tiles(N, F, itemsize, block_budget_bytes):
    """Pick (tile_n, tile_f) for a bandwidth-bound (N, F) elementwise stream.

    Legality: tile_n must be a multiple of the sublane step or equal N;
    tile_f must be a multiple of 128 or equal F.  Per-step working set
    (x + out double-buffered, plus the (3, tile_f) param block) stays within
    block_budget_bytes.
    """
    sub = max(8, 32 // itemsize)          # dtype-aware sublane step
    LANE = 128

    min_rows = N if N < sub else sub
    # rows that fit with full-width feature blocks: 4*tn*F (x+out, 2 bufs) + 6*F (params)
    max_rows_full = (block_budget_bytes // itemsize - 6 * F) // (4 * F)

    if max_rows_full >= min_rows:
        # Full-width feature blocks: one fully contiguous HBM range per DMA.
        tile_f = F
        tile_n = min(N, max_rows_full, 1024)
        if tile_n < N:
            tile_n = max(sub, (tile_n // sub) * sub)
    else:
        # F too large for full rows: stream the feature axis with few rows.
        tile_n = min(N, sub)
        max_f = (block_budget_bytes // itemsize) // (4 * tile_n + 6)
        tile_f = max(LANE, (min(max_f, F) // LANE) * LANE)

    # Guarantee >= 2 blocks along a 'parallel' axis so both v7x TensorCores
    # get work (costs one ~0.35us grid step on 1-TC chips -> negligible).
    if pl.cdiv(F, tile_f) * pl.cdiv(N, tile_n) == 1:
        half_f = ((pl.cdiv(F, 2) + LANE - 1) // LANE) * LANE
        if half_f < F:
            tile_f = half_f
        else:
            half_n = ((pl.cdiv(N, 2) + sub - 1) // sub) * sub
            if half_n < N:
                tile_n = half_n

    return tile_n, tile_f


# ---------------------------------------------------------------------------
# Wrapper
# ---------------------------------------------------------------------------
def bound_leaky_relu_step(x_nchw, right, left_slope, right_slope):
    """x_nchw: (N, C, H, W); right/left_slope/right_slope: (1, C, H, W)."""
    orig_shape = x_nchw.shape
    N = orig_shape[0]
    F = math.prod(orig_shape[1:])
    dtype = x_nchw.dtype
    itemsize = jnp.dtype(dtype).itemsize

    x2d = x_nchw.reshape(N, F)
    # Pack the three per-neuron parameter planes into one (3, F) array:
    # one param DMA descriptor per feature block instead of three.
    params = jnp.concatenate(
        [right.reshape(1, F).astype(dtype),
         left_slope.reshape(1, F).astype(dtype),
         right_slope.reshape(1, F).astype(dtype)],
        axis=0,
    )

    vmem_cap = _vmem_capacity_bytes()
    block_budget = min(vmem_cap // 2, 48 * 1024 * 1024)
    tile_n, tile_f = _select_tiles(N, F, itemsize, block_budget)

    # Feature axis outer, batch axis inner: the (3, tile_f) param block keeps
    # the same block index across the inner batch loop (not re-DMA'd per row
    # block).  Both axes are independent -> 'parallel' (megacore sharding).
    grid = (pl.cdiv(F, tile_f), pl.cdiv(N, tile_n))

    cost = pl.CostEstimate(
        flops=5 * N * F,
        transcendentals=0,
        bytes_accessed=(2 * N * F + 3 * F) * itemsize,
    )

    out2d = pl.pallas_call(
        bound_leaky_relu_step_kernel,
        out_shape=jax.ShapeDtypeStruct((N, F), dtype),
        grid_spec=pltpu.PrefetchScalarGridSpec(
            num_scalar_prefetch=0,
            grid=grid,
            in_specs=[
                pl.BlockSpec((tile_n, tile_f), lambda j, i: (i, j)),
                pl.BlockSpec((3, tile_f), lambda j, i: (0, j)),
            ],
            out_specs=pl.BlockSpec((tile_n, tile_f), lambda j, i: (i, j)),
        ),
        compiler_params=pltpu.CompilerParams(
            dimension_semantics=("parallel", "parallel"),
            vmem_limit_bytes=min(vmem_cap * 3 // 4, 96 * 1024 * 1024),
        ),
        cost_estimate=cost,
    )(x2d, params)

    return out2d.reshape(orig_shape)


# ---------------------------------------------------------------------------
# Pure-JAX reference (mask-multiply form, mirrors the PyTorch forward)
# ---------------------------------------------------------------------------
def reference(x, right, ls, rs):
    minus = (x < 0.0).astype(x.dtype)
    plus = (x > right).astype(x.dtype)
    medium = 1.0 - jnp.maximum(minus, plus)
    return (ls * x) * minus + x * medium + (rs * x + (1.0 - rs) * right) * plus


def _make_inputs(key, shape):
    kx, kr, kls, krs = jax.random.split(key, 4)
    N = shape[0]
    pshape = (1,) + tuple(shape[1:])
    x = 2.0 * jax.random.normal(kx, shape, dtype=jnp.float32)

    # Parameters per BoundLeakyReLUStep.init_parameter / update_parameter:
    #   right = 1 (+ perturbation), clamped >= 1e-4
    #   left/right_slope = 0.001 (+ perturbation), clamped >= 0
    right = jnp.ones(pshape, jnp.float32) \
        + 0.2 * jax.random.normal(kr, pshape, dtype=jnp.float32)
    right = jnp.clip(right, 1e-4, None)

    left_slope = 0.001 * jnp.ones(pshape, jnp.float32) \
        + 0.0005 * jax.random.normal(kls, pshape, dtype=jnp.float32)
    left_slope = jnp.clip(left_slope, 0.0, None)

    right_slope = 0.001 * jnp.ones(pshape, jnp.float32) \
        + 0.0005 * jax.random.normal(krs, pshape, dtype=jnp.float32)
    right_slope = jnp.clip(right_slope, 0.0, None)

    return x, right, left_slope, right_slope


if __name__ == "__main__":
    key = jax.random.PRNGKey(0)
    k1, k2, k3 = jax.random.split(key, 3)

    # Small shape consistent with the module (batch=2, channels=4, spatial=16).
    # F=1024 -> full-width block, split once along features for the 2-TC case.
    x, r, ls, rs = _make_inputs(k1, (2, 4, 16, 16))
    out = jax.block_until_ready(bound_leaky_relu_step(x, r, ls, rs))
    ref = reference(x, r, ls, rs)
    assert out.shape == x.shape
    assert jnp.allclose(out, ref, atol=1e-5, rtol=1e-5), "kernel mismatch (small)"

    # Awkward shape: F=765 (not a lane multiple), N=10 (not a sublane multiple).
    # Exercises the no-pad cdiv grid with masked partial edge blocks.
    x2, r2, ls2, rs2 = _make_inputs(k2, (10, 3, 15, 17))
    out2 = jax.block_until_ready(bound_leaky_relu_step(x2, r2, ls2, rs2))
    ref2 = reference(x2, r2, ls2, rs2)
    assert out2.shape == x2.shape
    assert jnp.allclose(out2, ref2, atol=1e-5, rtol=1e-5), "kernel mismatch (ragged)"

    # Larger shape exercising a multi-block grid (F = 8192).
    x3, r3, ls3, rs3 = _make_inputs(k3, (16, 32, 16, 16))
    out3 = jax.block_until_ready(bound_leaky_relu_step(x3, r3, ls3, rs3))
    ref3 = reference(x3, r3, ls3, rs3)
    assert out3.shape == x3.shape
    assert jnp.allclose(out3, ref3, atol=1e-5, rtol=1e-5), "kernel mismatch (grid)"

    print("KERNEL_OK")
</pallas_src>

<mosaic_0001>
module attributes {stable_mosaic.version = 11 : i64} {
  func.func @bound_leaky_relu_step_kernel(%arg0: i32, %arg1: i32, %arg2: memref<2x512xf32, #tpu.memory_space<vmem>>, %arg3: memref<3x512xf32, #tpu.memory_space<vmem>>, %arg4: memref<2x512xf32, #tpu.memory_space<vmem>>) attributes {dimension_semantics = [#tpu.dimension_semantics<parallel>, #tpu.dimension_semantics<parallel>], iteration_bounds = array<i64: 2, 1>, scalar_prefetch = 0 : i64, scratch_operands = 0 : i64, tpu.core_type = #tpu.core_type<tc>, window_params = [{transform_indices = @transform_0, window_bounds = array<i64: 2, 512>}, {transform_indices = @transform_1, window_bounds = array<i64: 3, 512>}, {transform_indices = @transform_2, window_bounds = array<i64: 2, 512>}]} {
    %c0 = arith.constant 0 : index
    %c0_0 = arith.constant 0 : index
    %0 = vector.load %arg2[%c0, %c0_0] : memref<2x512xf32, #tpu.memory_space<vmem>>, vector<2x512xf32>
    %c0_1 = arith.constant 0 : index
    %c0_2 = arith.constant 0 : index
    %1 = vector.load %arg3[%c0_1, %c0_2] : memref<3x512xf32, #tpu.memory_space<vmem>>, vector<1x512xf32>
    %c1 = arith.constant 1 : index
    %c0_3 = arith.constant 0 : index
    %2 = vector.load %arg3[%c1, %c0_3] : memref<3x512xf32, #tpu.memory_space<vmem>>, vector<1x512xf32>
    %c2 = arith.constant 2 : index
    %c0_4 = arith.constant 0 : index
    %3 = vector.load %arg3[%c2, %c0_4] : memref<3x512xf32, #tpu.memory_space<vmem>>, vector<1x512xf32>
    %4 = vector.broadcast %1 : vector<1x512xf32> to vector<2x512xf32>
    %5 = arith.subf %0, %4 : vector<2x512xf32>
    %6 = vector.broadcast %3 : vector<1x512xf32> to vector<2x512xf32>
    %7 = arith.mulf %6, %5 : vector<2x512xf32>
    %8 = vector.broadcast %1 : vector<1x512xf32> to vector<2x512xf32>
    %9 = arith.addf %7, %8 : vector<2x512xf32>
    %cst = arith.constant 0.000000e+00 : f32
    %10 = vector.broadcast %cst : f32 to vector<2x512xf32>
    %11 = arith.cmpf olt, %0, %10 : vector<2x512xf32>
    %12 = vector.broadcast %2 : vector<1x512xf32> to vector<2x512xf32>
    %13 = arith.mulf %12, %0 : vector<2x512xf32>
    %14 = vector.broadcast %1 : vector<1x512xf32> to vector<2x512xf32>
    %15 = arith.cmpf ogt, %0, %14 : vector<2x512xf32>
    %16 = arith.select %15, %9, %0 : vector<2x512xi1>, vector<2x512xf32>
    %17 = arith.select %11, %13, %16 : vector<2x512xi1>, vector<2x512xf32>
    %c0_5 = arith.constant 0 : index
    %c0_6 = arith.constant 0 : index
    %18 = vector.load %arg4[%c0_5, %c0_6] : memref<2x512xf32, #tpu.memory_space<vmem>>, vector<2x512xf32>
    tpu.vector_store %arg4[%c0_5, %c0_6], %17 {strides = array<i32>} : memref<2x512xf32, #tpu.memory_space<vmem>>, vector<2x512xf32>,
    return
  }
  func.func @transform_0(%arg0: i32, %arg1: i32) -> (i32, i32) {
    %c0_i32 = arith.constant 0 : i32
    return %arg1, %arg0 : i32, i32
  }
  func.func @transform_1(%arg0: i32, %arg1: i32) -> (i32, i32) {
    %c0_i32 = arith.constant 0 : i32
    %c0_i32_0 = arith.constant 0 : i32
    return %c0_i32, %arg0 : i32, i32
  }
  func.func @transform_2(%arg0: i32, %arg1: i32) -> (i32, i32) {
    %c0_i32 = arith.constant 0 : i32
    return %arg1, %arg0 : i32, i32
  }
}

</mosaic_0001>

<bundles_post_ra>
// kernel: tpu_custom_call.1
= control target key start
LH: loop header
LB: loop body
LE: loop exit
PB: predicated region body
PF: predicated region fallthrough
CT: control target
= control target key end

     0   :  { %7 = vsyncpa [#allocation3], 0  ;;  %s862_s0 = inlined_call_operand.hbm [shape: f32[2,1024], index: 0, kind: input, shape index: {}]   ;;  %s863_s1 = inlined_call_operand.hbm [shape: f32[3,1024], index: 1, kind: input, shape index: {}]   ;;  %s864_s2 = inlined_call_operand.hbm [shape: f32[2,1024], index: 2, kind: output, shape index: {}]  }
   0x1   :  { %9 = vsyncpa [#allocation3 + $0x1], 0 }
   0x2   :  { %10 = vsyncpa [#allocation6], 0 }
   0x3   :  { %12 = vsyncpa [#allocation6 + $0x1], 0 }
   0x4   :  { %13 = vsyncpa [#allocation4], 0 }
   0x5   :  { %15 = vsyncpa [#allocation4 + $0x1], 0  ;;  %s706_s9 = smov 0   ;;  %s708_s10 = smov 0  }
   0x6   :  { %s710_s11 = smov 0   ;;  %s712_s12 = smov 0  }
   0x7   :  { %s714_s13 = smov 0   ;;  %s716_s14 = smov 0  }
   0x8 LB: > { %s452_s15 = sadd.s32 4294967295, %s689_s14   ;;  %s453_s16 = sadd.s32 4294967294, %s689_s14   ;;  %s689_s14 = sphi %s716_s14, %s21_s14   ;;  %s685_s13 = sphi %s714_s13, %s874_s13   ;;  %s681_s12 = sphi %s712_s12, %s873_s12   ;;  %s677_s11 = sphi %s710_s11, %s872_s11   ;;  %s673_s10 = sphi %s708_s10, %s871_s10   ;;  %s669_s9 = sphi %s706_s9, %s870_s9  }
   0x9   : > { %s33_s17 = sadd.s32 1, %s685_s13  ;;  %s42_s18 = sadd.s32 1, %s677_s11 }
   0xa   : > { %p35_p0 = scmp.ge.s32.totalorder %s33_s17, 2  ;;  %p49_p1 = scmp.ne.s32.totalorder %s677_s11, %s673_s10 }
   0xb   : > { %p50_p2 = scmp.eq.s32.totalorder %s689_s14, 0  ;;  %p55_p3 = scmp.ne.s32.totalorder %s673_s10, %s669_s9 }
   0xc   : > { %s876_s17 = smov (%p35_p0, %s33_s17), 0  ;;  %p56_p5 = scmp.eq.s32.totalorder %s452_s15, 0 }
   0xd   : > { %p747_p4 = por %p50_p2, %p49_p1  ;;  %s38_s20 = ssub.s32 %s685_s13, %s876_s17 }
   0xe   : > { %p107_p6 = scmp.eq.s32.totalorder %s452_s15, 1  ;;  %p40_p7 = scmp.eq.s32.totalorder %s38_s20, 0 }
   0xf   : > { %p753_p8 = por %p56_p5, %p55_p3  ;;  %p113_p10 = scmp.eq.s32.totalorder %s453_s16, 1 }
  0x10   : > { %p757_p9 = por %p107_p6, %p49_p1  ;;  %p455_p12 = scmp.ge.s32.totalorder %s689_s14, 2 }
  0x11   : > { %s762_s23 = scalar_select %p40_p7, %s677_s11, %s42_s18  }
  0x12   : > { %p764_p11 = por %p113_p10, %p55_p3  ;;  %p493_p13 = scmp.lt.s32.totalorder %s689_s14, 2 }
  0x13   : > { %s133_s25 = sand.u32 1, %s677_s11   ;;  %s473_s27 = sshll.u32 %s685_s13, 3 }
  0x14   : > { %s456_s26 = sshll.u32 %s133_s25, 3  ;;  %s144_s30 = scalar_lea.hbm %s862_s0, %s473_s27 }
  0x15   : > { %s137_s3 = scalar_lea.vmem [#allocation2], %s456_s26  ;;  %s146_s5 = sshll.u32 %s144_s30, 4  ;;  %s147_s5 = int_to_ptr.hbm [resolvable:$true] %s146_s5 }
  0x16   : > { %s148_s4 = sshll.u32 %s137_s3, 4  ;;  %p777_p0 = pnand %p493_p13, %p747_p4  ;;  %s149_s4 = int_to_ptr.vmem [resolvable:$true] %s148_s4 }
  0x17   : > { %p462_p1 = scmp.ge.s32.totalorder %s689_s14, 1  ;;  %p173_p2 = scmp.lt.s32.totalorder %s689_s14, 3 }
  0x18   : > { %s134_s7 = scalar_lea.sflag [#allocation3], %s133_s25  ;;  %s459_s8 = sshll.u32 %s133_s25, 4 }
  0x19   : > { %485 = dma.hbm_to_vmem [thread:$0]  (!%p777_p0), %s147_s5, 128, %s149_s4, %s134_s7  }
  0x1a   : > { %p174_p3 = pnand %p462_p1, %p173_p2  ;;  %s474_s15 = sshll.u32 %s685_s13, 4 }
  0x1b   : > { %s164_s20 = scalar_lea.hbm %s863_s1, %s474_s15  ;;  %s159_s26 = scalar_lea.vmem [#allocation5], %s459_s8 }
  0x1c   : > { %s168_s19 = sshll.u32 %s159_s26, 4  ;;  %s166_s27 = sshll.u32 %s164_s20, 4  ;;  %s169_s19 = int_to_ptr.vmem [resolvable:$true] %s168_s19  ;;  %s167_s27 = int_to_ptr.hbm [resolvable:$true] %s166_s27 }
  0x1d   : > { %s156_s28 = scalar_lea.sflag [#allocation6], %s133_s25  ;;  %177 = sbr.rel (%p174_p3) target bundleno = 75 (0x4b), region = 28 }
  0x1e   : > { %488 = dma.hbm_to_vmem [thread:$0]  (!%p777_p0), %s167_s27, 256, %s169_s19, %s156_s28  }
  0x1f   : > { %s792_s29 = sand.u32 (!%p174_p3), 1, %s673_s10  }
  0x20   : > { %s463_s30 = sshll.u32 (!%p174_p3), %s792_s29, 3  ;;  %s180_s3 = scalar_lea.sflag (!%p174_p3), [#allocation3], %s792_s29 }
  0x21   : > { %s183_s4 = scalar_lea.vmem (!%p174_p3), [#allocation2], %s463_s30 }
  0x22   : > { %656 = dma.done.wait (%p753_p8), %s180_s3, 128  }
  0x23   : > { %658 = vsyncadd (%p753_p8), %s180_s3, 4294967168  ;;  %s464_s25 = sshll.u32 %s792_s29, 4  ;;  %s190_s5 = scalar_lea.sflag [#allocation6], %s792_s29 }
  0x24   : > { %s804_s6 = scalar_lea.vmem [#allocation5], %s464_s25 }
  0x25   : > { %660 = dma.done.wait (%p753_p8), %s190_s5, 256  }
  0x26   : > { %662 = vsyncadd (%p753_p8), %s190_s5, 4294967040  ;;  %v224_v0 = vld [vmem:[%s804_s6] ss:$4 sm:$0xf]  ;;  %vm241_vm0 = vcmask 1041408   ;;  %vm243_vm1 = vcmask 1045508  }
  0x27   : > { %v230_v1 = vperm.slane %v224_v0, 0  ;;  %v231_v2 = vperm.slane %v224_v0, 1  ;;  %v232_v3 = vperm.slane %v224_v0, 2  ;;  %v233_v4 = vperm.slane %v224_v0, 3  ;;  %v223_v8 = vld [vmem:[%s183_s4] sm:$0xff]  ;;  %s475_s21 = sshll.u32 %s681_s12, 3 }
  0x28   : > { %vm245_vm2 = vcmask 1043456   ;;  %v467_v13 = vld [vmem:[%s804_s6 + $0x2] ss:$4 sm:$0xf]  ;;  %s340_s15 = scalar_lea.hbm %s864_s2, %s475_s21  ;;  %s219_s12 = scalar_lea.vmem [#allocation7], %s463_s30  ;;  %vm276_vm4 = vcmp.lt.f32.partialorder %v223_v8, 0.0 }
  0x29   : > { %v238_v5 = vrot.slane %v231_v2, 6  ;;  %v239_v6 = vrot.slane %v232_v3, 4  ;;  %v240_v7 = vrot.slane %v233_v4, 2  ;;  %v251_v14 = vperm.slane %v467_v13, 1  ;;  %s342_s16 = sshll.u32 %s219_s12, 4  ;;  %s344_s18 = sshll.u32 %s340_s15, 4  ;;  %s343_s16 = int_to_ptr.vmem [resolvable:$true] %s342_s16  ;;  %s345_s18 = int_to_ptr.hbm [resolvable:$true] %s344_s18 }
  0x2a   : > { %v252_v15 = vperm.slane %v467_v13, 2  ;;  %v253_v16 = vperm.slane %v467_v13, 3  ;;  %v250_v17 = vperm.slane %v467_v13, 0  ;;  %v466_v25 = vld [vmem:[%s804_s6 + $0x1] ss:$4 sm:$0xf] }
  0x2b   : > { %v242_v9 = vsel %vm241_vm0, %v230_v1, %v238_v5  ;;  %v244_v10 = vsel %vm243_vm1, %v239_v6, %v240_v7  ;;  %v279_v30 = vperm.slane %v466_v25, 1  ;;  %v280_v34 = vperm.slane %v466_v25, 2  ;;  %s327_s20 = scalar_lea.sflag [#allocation4], %s792_s29  ;;  %s617_s26 = sshra.s32 %s345_s18, 4  ;;  %s618_s26 = int_to_ptr.hbm [resolvable:$true] %s617_s26 }
  0x2c   : > { %v246_v11 = vsel %vm245_vm2, %v242_v9, %v244_v10  ;;  %v281_v35 = vperm.slane %v466_v25, 3  ;;  %v278_v37 = vperm.slane %v466_v25, 0  ;;  %s619_s19 = scalar_lea.hbm %s618_s26, 8  ;;  %s623_s30 = scalar_lea.hbm %s864_s2, 16 }
  0x2d   : > { %v248_v12 = vsub.f32 %v223_v8, %v246_v11  ;;  %vm300_vm3 = vcmp.gt.f32.partialorder %v223_v8, %v246_v11  ;;  %p620_p4 = scmp.ne.s32.totalorder %s618_s26, %s619_s19  ;;  %p624_p7 = scmp.lt.s32.totalorder %s618_s26, %s864_s2 }
  0x2e   : > { %p625_p8 = scmp.lt.s32.totalorder %s623_s30, %s619_s19 }
  0x2f   : > { %259 = vst [vmem:[#allocation1] ss:$4 sm:$0xff] %v248_v12  ;;  %p621_p5 = pnand %p620_p4, %p757_p9 }
  0x30   : > { %p626_p10 = por %p625_p8, %p624_p7 }
  0x31   : > { %p622_p6 = pneg %p621_p5 }
  0x33   : > { %p627_p13 = pnand %p626_p10, %p622_p6 }
  0x36   : > { %v260_v18 = vld.sshfl [vmem:[#allocation1] sm:$0xff pattern:$0x73625140]  ;;  %v261_v19 = vld.sshfl [vmem:[#allocation1 + $0x8] sm:$0xff pattern:$0x73625140] }
  0x37   : > { %v262_v20 = vld.sshfl [vmem:[#allocation1 + $0x10] sm:$0xff pattern:$0x73625140]  ;;  %v263_v21 = vld.sshfl [vmem:[#allocation1 + $0x18] sm:$0xff pattern:$0x73625140]  ;;  %v269_v22 = vmul.f32 %v261_v19, %v251_v14  ;;  %v268_v27 = vmul.f32 %v260_v18, %v250_v17 }
  0x38   : > { %v270_v23 = vmul.f32 %v262_v20, %v252_v15  ;;  %v271_v24 = vmul.f32 %v263_v21, %v253_v16  ;;  %287 = vst [vmem:[#allocation1] ss:$4 sm:$0xff] %v223_v8 }
  0x39   : > { %v273_v26 = vadd.f32 %v269_v22, %v231_v2  ;;  %v272_v36 = vadd.f32 %v268_v27, %v230_v1 }
  0x3a   : > { %v274_v28 = vadd.f32 %v270_v23, %v232_v3  ;;  %v275_v29 = vadd.f32 %v271_v24, %v233_v4 }
  0x3b   : > { %v305_v31 = vrot.slane %v273_v26, 6 }
  0x3c   : > { %v306_v32 = vrot.slane %v274_v28, 4  ;;  %v307_v33 = vrot.slane %v275_v29, 2 }
  0x3d   : > { %v308_v43 = vsel %vm241_vm0, %v272_v36, %v305_v31 }
  0x3e   : > { %v309_v44 = vsel %vm243_vm1, %v306_v32, %v307_v33 }
  0x3f   : > { %v288_v38 = vld.sshfl [vmem:[#allocation1] sm:$0xff pattern:$0x73625140]  ;;  %v289_v39 = vld.sshfl [vmem:[#allocation1 + $0x8] sm:$0xff pattern:$0x73625140]  ;;  %v310_v49 = vsel %vm245_vm2, %v308_v43, %v309_v44 }
  0x40   : > { %v290_v40 = vld.sshfl [vmem:[#allocation1 + $0x10] sm:$0xff pattern:$0x73625140]  ;;  %v291_v41 = vld.sshfl [vmem:[#allocation1 + $0x18] sm:$0xff pattern:$0x73625140]  ;;  %v297_v42 = vmul.f32 %v289_v39, %v279_v30  ;;  %v296_v47 = vmul.f32 %v288_v38, %v278_v37  ;;  %v312_v54 = vsel %vm300_vm3, %v310_v49, %v223_v8 }
  0x41   : > { %v298_v45 = vmul.f32 %v290_v40, %v280_v34  ;;  %v299_v46 = vmul.f32 %v291_v41, %v281_v35 }
  0x42   : > { %v317_v48 = vrot.slane %v297_v42, 6 }
  0x43   : > { %v318_v50 = vrot.slane %v298_v45, 4  ;;  %v319_v51 = vrot.slane %v299_v46, 2 }
  0x44   : > { %v320_v52 = vsel %vm241_vm0, %v296_v47, %v317_v48 }
  0x45   : > { %v321_v53 = vsel %vm243_vm1, %v318_v50, %v319_v51 }
  0x46   : > { %v322_v55 = vsel %vm245_vm2, %v320_v52, %v321_v53 }
  0x47   : > { %v324_v56 = vsel %vm276_vm4, %v322_v55, %v312_v54 }
  0x48   : > { %325 = vst [vmem:[%s219_s12] sm:$0xff] %v324_v56 }
  0x49   : > { %630 = shalt.err (!%p627_p13)
}
  0x4a   : > { %480 = dma.vmem_to_hbm [thread:$0]  (%p757_p9), %s343_s16, 128, %s345_s18, %s327_s20  }
  0x4b PF: > { %s356_s29 = sand.u32 1, %s669_s9   ;;  %p490_p0 = pnand %p455_p12, %p764_p11 }
  0x4c   : > { %s357_s25 = scalar_lea.sflag [#allocation4], %s356_s29 }
  0x4d   : > { %p491_p1 = pneg %p490_p0 }
  0x4f   : > { %664 = dma.done.wait (%p491_p1), %s357_s25, 128  }
  0x50   : > { %666 = vsyncadd (%p491_p1), %s357_s25, 4294967168  ;;  %s21_s14 = sadd.s32 1, %s689_s14   ;;  %s870_s9 = smov %s673_s10 }
  0x51   : > { %p18_p2 = scmp.ge.s32.totalorder %s21_s14, 4   ;;  %s871_s10 = smov %s677_s11 }
  0x52   : > { %s872_s11 = smov %s762_s23  ;;  %s873_s12 = smov %s685_s13 }
  0x53   : > { %s874_s13 = smov %s876_s17  ;;  %20 = sbr.rel (!%p18_p2) target bundleno = 8 (0x8), region = 88 }
  0x58   :  { %363 = vsyncpa [#allocation3], 1 }
  0x59   :  { %365 = vsyncpa [#allocation3 + $0x1], 1 }
  0x5a   :  { %366 = vsyncpa [#allocation6], 1 }
  0x5b   :  { %368 = vsyncpa [#allocation6 + $0x1], 1 }
  0x5c   :  { %369 = vsyncpa [#allocation4], 1 }
  0x5d   :  { %371 = vsyncpa [#allocation4 + $0x1], 1 }

</bundles_post_ra>
